<compile_context>
chip_gen: v5e
topology: v5e:2x2
jax: 0.10.0
libtpu: 0.0.40
codegen_flags: <defaults>
</compile_context>

<pallas_src>
import functools
import math

import jax
import jax.numpy as jnp
from jax import lax
from jax.experimental import pallas as pl
from jax.experimental.pallas import tpu as pltpu


def _round_up(x, m):
    return ((x + m - 1) // m) * m


# ----------------------------------------------------------------------------
# Pallas kernel: fused relu(W1@x+b1) -> relu(W2@.+b2) -> relu(W3@.+b3) -> W4@.+b4
# Layout: channels on sublanes (rows), pixels on lanes (cols).
# ----------------------------------------------------------------------------
def _decoder_kernel(x_ref,
                    w1_ref, b1_ref,
                    w2_ref, b2_ref,
                    w3_ref, b3_ref,
                    w4_ref, b4_ref,
                    o_ref,
                    *, sub_px, n_sub):
    # bf16 weights, full VMEM-resident blocks (tiny).
    W1 = w1_ref[...]
    W2 = w2_ref[...]
    W3 = w3_ref[...]
    W4 = w4_ref[...]
    # Raw (Cout, 1) biases -- NOT broadcast to (Cout, sub_px).  The per-chunk
    # bias add is free VALU filler under the MXU-bound regime; the old hoisted
    # broadcasts pinned ~32 vregs across the inner loop.
    b1 = b1_ref[...]
    b2 = b2_ref[...]
    b3 = b3_ref[...]
    b4 = b4_ref[...]

    def chunk(start):
        # bf16 dot operands, f32 accumulation; bias/ReLU in f32.
        x = x_ref[0, :, pl.ds(start, sub_px)].astype(jnp.bfloat16)
        h = jnp.dot(W1, x, preferred_element_type=jnp.float32) + b1
        h = jnp.maximum(h, 0.0).astype(jnp.bfloat16)
        h = jnp.dot(W2, h, preferred_element_type=jnp.float32) + b2
        h = jnp.maximum(h, 0.0).astype(jnp.bfloat16)
        h = jnp.dot(W3, h, preferred_element_type=jnp.float32) + b3
        h = jnp.maximum(h, 0.0).astype(jnp.bfloat16)
        y = jnp.dot(W4, h, preferred_element_type=jnp.float32) + b4
        o_ref[0, :, pl.ds(start, sub_px)] = y.astype(o_ref.dtype)

    if n_sub == 1:
        chunk(0)
    else:
        # unroll=2: keeps MXU-push overlap across chunks while bounding vreg
        # live ranges (full unroll over 16+ chunks risked spills).
        def body(c, carry):
            chunk(pl.multiple_of(c * sub_px, sub_px))
            return carry
        lax.fori_loop(0, n_sub, body, 0, unroll=2)


def _run_decoder(x3, w1, b1, w2, b2, w3, b3, w4, b4, *, tile, sub):
    """x3: (B, Cin, HW_pad) f32, HW_pad % sub == 0, tile % sub == 0, sub % 128 == 0."""
    B, C, HWp = x3.shape
    cout_pad = w4.shape[0]
    n_tiles = pl.cdiv(HWp, tile)           # last block may be partial (Pallas-masked)
    kernel = functools.partial(_decoder_kernel, sub_px=sub, n_sub=tile // sub)

    full = lambda a: pl.BlockSpec(a.shape, lambda b, j: (0, 0))

    return pl.pallas_call(
        kernel,
        out_shape=jax.ShapeDtypeStruct((B, cout_pad, HWp), jnp.float32),
        grid_spec=pltpu.PrefetchScalarGridSpec(
            num_scalar_prefetch=0,
            grid=(B, n_tiles),
            in_specs=[
                pl.BlockSpec((1, C, tile), lambda b, j: (b, 0, j)),   # pixel tile
                full(w1), full(b1),
                full(w2), full(b2),
                full(w3), full(b3),
                full(w4), full(b4),
            ],
            out_specs=pl.BlockSpec((1, cout_pad, tile), lambda b, j: (b, 0, j)),
        ),
        compiler_params=pltpu.CompilerParams(
            dimension_semantics=("parallel", "parallel")),
    )(x3, w1, b1, w2, b2, w3, b3, w4, b4)


# ----------------------------------------------------------------------------
# Wrapper: NCHW -> (B, C, HW) [free reshape] -> kernel -> NCHW
# ----------------------------------------------------------------------------
@functools.partial(jax.jit, static_argnames=("tile_px", "sub_px"))
def embedding_decoder_forward(x_nchw, params, *, tile_px=8192, sub_px=512):
    assert sub_px % 128 == 0 and tile_px % sub_px == 0
    B, C, H, W = x_nchw.shape
    HW = H * W
    cout = params["w4"].shape[0]
    cout_pad = _round_up(cout, 8)           # dense (8,128)-aligned stores

    # Sub-chunk / tile sizing. Pad only to a sub multiple (usually a no-op),
    # not to a full tile -> no extra HBM round trips outside the kernel.
    sub = min(sub_px, _round_up(HW, 128))
    HW_pad = _round_up(HW, sub)
    tile = min(tile_px, HW_pad)
    n_tiles = pl.cdiv(HW_pad, tile)
    # v7x has 2 TensorCores per chip: guarantee >= 2 grid steps when the pixel
    # axis allows it, so both cores get work.
    if B * n_tiles < 2 and HW_pad // sub >= 2:
        tile = ((HW_pad // sub + 1) // 2) * sub
        n_tiles = pl.cdiv(HW_pad, tile)

    x3 = x_nchw.reshape(B, C, HW)           # free reshape, no transpose
    if HW_pad != HW:
        x3 = jnp.pad(x3, ((0, 0), (0, 0), (0, HW_pad - HW)))

    # bf16 weights (f32 accumulation inside the kernel).  Pad the last two
    # layers to 8 channels (zero rows/cols) so intermediate and output tiles
    # are exact (8,128) vreg tiles; the zero output channel is sliced off.
    w1 = params["w1"].astype(jnp.bfloat16)
    w2 = params["w2"].astype(jnp.bfloat16)
    w3, b3 = params["w3"], params["b3"]
    w4, b4 = params["w4"], params["b4"]
    if cout_pad != cout:
        pad_r = cout_pad - cout
        w3 = jnp.pad(w3, ((0, pad_r), (0, 0)))
        b3 = jnp.pad(b3, ((0, pad_r), (0, 0)))
        w4 = jnp.pad(w4, ((0, pad_r), (0, pad_r)))
        b4 = jnp.pad(b4, ((0, pad_r), (0, 0)))
    w3 = w3.astype(jnp.bfloat16)
    w4 = w4.astype(jnp.bfloat16)

    y3 = _run_decoder(x3, w1, params["b1"], w2, params["b2"],
                      w3, b3, w4, b4, tile=tile, sub=sub)

    if cout_pad != cout or HW_pad != HW:
        y3 = y3[:, :cout, :HW]
    return y3.reshape(B, cout, H, W)


# ----------------------------------------------------------------------------
# Parameter construction (mirrors the module __init__); weights stored (Cout, Cin)
# ----------------------------------------------------------------------------
def _kaiming_uniform_conv(key, cout, cin):
    # PyTorch Conv2d default init (kaiming_uniform, a=sqrt(5)) -> bound 1/sqrt(fan_in)
    bound = 1.0 / math.sqrt(cin)     # kernel_size = 1
    kw, kb = jax.random.split(key)
    w = jax.random.uniform(kw, (cout, cin), jnp.float32, -bound, bound)
    b = jax.random.uniform(kb, (cout, 1), jnp.float32, -bound, bound)
    return w, b


def make_params(in_channels, out_channels_list, scale, bias, seed=0):
    key = jax.random.PRNGKey(seed)
    k1, k2, k3, k4 = jax.random.split(key, 4)
    total_out = sum(out_channels_list)

    w1, b1 = _kaiming_uniform_conv(k1, 32, in_channels)
    w2, b2 = _kaiming_uniform_conv(k2, 16, 32)
    w3, b3 = _kaiming_uniform_conv(k3, total_out, 16)

    # regressor: per-group xavier_uniform(gain=s) on weight row-blocks, constant bias
    w4_rows, b4_vals = [], []
    kreg = jax.random.split(k4, len(out_channels_list))
    for kgrp, oc, b_c, s in zip(kreg, out_channels_list, bias, scale):
        fan_in = total_out
        fan_out = oc
        bound = s * math.sqrt(6.0 / (fan_in + fan_out))
        w4_rows.append(jax.random.uniform(kgrp, (oc, total_out), jnp.float32, -bound, bound))
        b4_vals.append(jnp.full((oc, 1), b_c, jnp.float32))
    w4 = jnp.concatenate(w4_rows, axis=0)     # (total_out, total_out)
    b4 = jnp.concatenate(b4_vals, axis=0)     # (total_out, 1)

    return dict(w1=w1, b1=b1, w2=w2, b2=b2, w3=w3, b3=b3, w4=w4, b4=b4)


# ----------------------------------------------------------------------------
# Pure-JAX reference (same channels-first math). dot_dtype=bfloat16 mirrors the
# kernel's MXU numerics (bf16 operands, f32 accumulation).
# ----------------------------------------------------------------------------
def reference_forward(x_nchw, p, dot_dtype=jnp.float32):
    B, C, H, W = x_nchw.shape
    t = x_nchw.reshape(B, C, H * W)

    def lin(w, b, t):
        return jnp.einsum('oc,bcp->bop', w.astype(dot_dtype), t.astype(dot_dtype),
                          preferred_element_type=jnp.float32) + b[None]

    h = jnp.maximum(lin(p["w1"], p["b1"], t), 0.0)
    h = jnp.maximum(lin(p["w2"], p["b2"], h), 0.0)
    h = jnp.maximum(lin(p["w3"], p["b3"], h), 0.0)
    y = lin(p["w4"], p["b4"], h)
    return y.reshape(B, -1, H, W)


if __name__ == "__main__":
    # Config consistent with SkeletonRecon: unet_embed_dim=4,
    # split_dimensions=[1, 3, 2, 1] (depth, xyz, cov, pi) with per-group
    # scale/bias inits for the regressor.
    in_channels = 4
    split_dimensions = [1, 3, 2, 1]
    scale = [1.0, 0.1, 0.05, 1.0]
    bias = [0.0, 0.0, 0.0, 0.0]

    params = make_params(in_channels, split_dimensions, scale, bias, seed=0)

    key = jax.random.PRNGKey(0)
    k_small, k_big = jax.random.split(key)

    # Small shape (single sub-chunk path).
    B, H, W = 2, 16, 16
    x = jax.random.normal(k_small, (B, in_channels, H, W), jnp.float32)
    y = jax.block_until_ready(embedding_decoder_forward(x, params))
    assert y.shape == (B, sum(split_dimensions), H, W), y.shape
    y_ref_bf16 = reference_forward(x, params, dot_dtype=jnp.bfloat16)
    assert jnp.allclose(y, y_ref_bf16, atol=1e-3, rtol=1e-3), "mismatch vs bf16 reference (16x16)"
    y_ref_f32 = reference_forward(x, params)
    assert jnp.allclose(y, y_ref_f32, atol=2e-1, rtol=1e-1), "mismatch vs f32 reference (16x16)"

    # Larger shape (multi sub-chunk fori_loop path).
    H2, W2 = 32, 32
    x2 = jax.random.normal(k_big, (B, in_channels, H2, W2), jnp.float32)
    y2 = jax.block_until_ready(embedding_decoder_forward(x2, params))
    assert y2.shape == (B, sum(split_dimensions), H2, W2), y2.shape
    y2_ref_bf16 = reference_forward(x2, params, dot_dtype=jnp.bfloat16)
    assert jnp.allclose(y2, y2_ref_bf16, atol=1e-3, rtol=1e-3), "mismatch vs bf16 reference (32x32)"
    y2_ref_f32 = reference_forward(x2, params)
    assert jnp.allclose(y2, y2_ref_f32, atol=2e-1, rtol=1e-1), "mismatch vs f32 reference (32x32)"

    print("KERNEL_OK")
</pallas_src>

<mosaic_0001>
module attributes {stable_mosaic.version = 11 : i64} {
  func.func @_decoder_kernel(%arg0: i32, %arg1: i32, %arg2: memref<1x4x256xf32, #tpu.memory_space<vmem>>, %arg3: memref<32x4xbf16, #tpu.memory_space<vmem>>, %arg4: memref<32x1xf32, #tpu.memory_space<vmem>>, %arg5: memref<16x32xbf16, #tpu.memory_space<vmem>>, %arg6: memref<16x1xf32, #tpu.memory_space<vmem>>, %arg7: memref<8x16xbf16, #tpu.memory_space<vmem>>, %arg8: memref<8x1xf32, #tpu.memory_space<vmem>>, %arg9: memref<8x8xbf16, #tpu.memory_space<vmem>>, %arg10: memref<8x1xf32, #tpu.memory_space<vmem>>, %arg11: memref<1x8x256xf32, #tpu.memory_space<vmem>>) attributes {dimension_semantics = [#tpu.dimension_semantics<parallel>, #tpu.dimension_semantics<parallel>], iteration_bounds = array<i64: 2, 1>, scalar_prefetch = 0 : i64, scratch_operands = 0 : i64, tpu.core_type = #tpu.core_type<tc>, window_params = [{transform_indices = @transform_0, window_bounds = array<i64: 1, 4, 256>}, {pipeline_mode = #tpu.pipeline_mode<synchronous>, transform_indices = @transform_1, window_bounds = array<i64: 32, 4>}, {pipeline_mode = #tpu.pipeline_mode<synchronous>, transform_indices = @transform_2, window_bounds = array<i64: 32, 1>}, {pipeline_mode = #tpu.pipeline_mode<synchronous>, transform_indices = @transform_3, window_bounds = array<i64: 16, 32>}, {pipeline_mode = #tpu.pipeline_mode<synchronous>, transform_indices = @transform_4, window_bounds = array<i64: 16, 1>}, {pipeline_mode = #tpu.pipeline_mode<synchronous>, transform_indices = @transform_5, window_bounds = array<i64: 8, 16>}, {pipeline_mode = #tpu.pipeline_mode<synchronous>, transform_indices = @transform_6, window_bounds = array<i64: 8, 1>}, {pipeline_mode = #tpu.pipeline_mode<synchronous>, transform_indices = @transform_7, window_bounds = array<i64: 8, 8>}, {pipeline_mode = #tpu.pipeline_mode<synchronous>, transform_indices = @transform_8, window_bounds = array<i64: 8, 1>}, {transform_indices = @transform_9, window_bounds = array<i64: 1, 8, 256>}]} {
    %c0 = arith.constant 0 : index
    %c0_0 = arith.constant 0 : index
    %0 = vector.load %arg3[%c0, %c0_0] : memref<32x4xbf16, #tpu.memory_space<vmem>>, vector<32x4xbf16>
    %c0_1 = arith.constant 0 : index
    %c0_2 = arith.constant 0 : index
    %1 = vector.load %arg5[%c0_1, %c0_2] : memref<16x32xbf16, #tpu.memory_space<vmem>>, vector<16x32xbf16>
    %c0_3 = arith.constant 0 : index
    %c0_4 = arith.constant 0 : index
    %2 = vector.load %arg7[%c0_3, %c0_4] : memref<8x16xbf16, #tpu.memory_space<vmem>>, vector<8x16xbf16>
    %c0_5 = arith.constant 0 : index
    %c0_6 = arith.constant 0 : index
    %3 = vector.load %arg9[%c0_5, %c0_6] : memref<8x8xbf16, #tpu.memory_space<vmem>>, vector<8x8xbf16>
    %c0_7 = arith.constant 0 : index
    %c0_8 = arith.constant 0 : index
    %4 = vector.load %arg4[%c0_7, %c0_8] : memref<32x1xf32, #tpu.memory_space<vmem>>, vector<32x1xf32>
    %c0_9 = arith.constant 0 : index
    %c0_10 = arith.constant 0 : index
    %5 = vector.load %arg6[%c0_9, %c0_10] : memref<16x1xf32, #tpu.memory_space<vmem>>, vector<16x1xf32>
    %c0_11 = arith.constant 0 : index
    %c0_12 = arith.constant 0 : index
    %6 = vector.load %arg8[%c0_11, %c0_12] : memref<8x1xf32, #tpu.memory_space<vmem>>, vector<8x1xf32>
    %c0_13 = arith.constant 0 : index
    %c0_14 = arith.constant 0 : index
    %7 = vector.load %arg10[%c0_13, %c0_14] : memref<8x1xf32, #tpu.memory_space<vmem>>, vector<8x1xf32>
    %c0_15 = arith.constant 0 : index
    %c0_16 = arith.constant 0 : index
    %c0_17 = arith.constant 0 : index
    %8 = vector.load %arg2[%c0_15, %c0_16, %c0_17] : memref<1x4x256xf32, #tpu.memory_space<vmem>>, vector<1x4x256xf32>
    %9 = vector.shape_cast %8 : vector<1x4x256xf32> to vector<4x256xf32>
    %10 = arith.truncf %9 : vector<4x256xf32> to vector<4x256xbf16>
    %cst = arith.constant dense<0.000000e+00> : vector<32x256xf32>
    %11 = tpu.matmul %0, %10, %cst {dimension_numbers = #tpu.dot_dimension_numbers<[1], [0], [0], [1], [0, 0, 1, 1], [], []>} : vector<32x4xbf16>, vector<4x256xbf16>, vector<32x256xf32> -> vector<32x256xf32>
    %12 = vector.broadcast %4 : vector<32x1xf32> to vector<32x256xf32>
    %13 = arith.addf %11, %12 : vector<32x256xf32>
    %cst_18 = arith.constant 0.000000e+00 : f32
    %14 = vector.broadcast %cst_18 : f32 to vector<32x256xf32>
    %15 = arith.maximumf %13, %14 : vector<32x256xf32>
    %16 = arith.truncf %15 : vector<32x256xf32> to vector<32x256xbf16>
    %cst_19 = arith.constant dense<0.000000e+00> : vector<16x256xf32>
    %17 = tpu.matmul %1, %16, %cst_19 {dimension_numbers = #tpu.dot_dimension_numbers<[1], [0], [0], [1], [0, 0, 1, 1], [], []>} : vector<16x32xbf16>, vector<32x256xbf16>, vector<16x256xf32> -> vector<16x256xf32>
    %18 = vector.broadcast %5 : vector<16x1xf32> to vector<16x256xf32>
    %19 = arith.addf %17, %18 : vector<16x256xf32>
    %cst_20 = arith.constant 0.000000e+00 : f32
    %20 = vector.broadcast %cst_20 : f32 to vector<16x256xf32>
    %21 = arith.maximumf %19, %20 : vector<16x256xf32>
    %22 = arith.truncf %21 : vector<16x256xf32> to vector<16x256xbf16>
    %cst_21 = arith.constant dense<0.000000e+00> : vector<8x256xf32>
    %23 = tpu.matmul %2, %22, %cst_21 {dimension_numbers = #tpu.dot_dimension_numbers<[1], [0], [0], [1], [0, 0, 1, 1], [], []>} : vector<8x16xbf16>, vector<16x256xbf16>, vector<8x256xf32> -> vector<8x256xf32>
    %24 = vector.broadcast %6 : vector<8x1xf32> to vector<8x256xf32>
    %25 = arith.addf %23, %24 : vector<8x256xf32>
    %cst_22 = arith.constant 0.000000e+00 : f32
    %26 = vector.broadcast %cst_22 : f32 to vector<8x256xf32>
    %27 = arith.maximumf %25, %26 : vector<8x256xf32>
    %28 = arith.truncf %27 : vector<8x256xf32> to vector<8x256xbf16>
    %cst_23 = arith.constant dense<0.000000e+00> : vector<8x256xf32>
    %29 = tpu.matmul %3, %28, %cst_23 {dimension_numbers = #tpu.dot_dimension_numbers<[1], [0], [0], [1], [0, 0, 1, 1], [], []>} : vector<8x8xbf16>, vector<8x256xbf16>, vector<8x256xf32> -> vector<8x256xf32>
    %30 = vector.broadcast %7 : vector<8x1xf32> to vector<8x256xf32>
    %31 = arith.addf %29, %30 : vector<8x256xf32>
    %c0_24 = arith.constant 0 : index
    %c0_25 = arith.constant 0 : index
    %c0_26 = arith.constant 0 : index
    %32 = vector.load %arg11[%c0_24, %c0_25, %c0_26] : memref<1x8x256xf32, #tpu.memory_space<vmem>>, vector<1x8x256xf32>
    %33 = vector.shape_cast %32 : vector<1x8x256xf32> to vector<8x256xf32>
    %34 = vector.shape_cast %31 : vector<8x256xf32> to vector<1x8x256xf32>
    tpu.vector_store %arg11[%c0_24, %c0_25, %c0_26], %34 {strides = array<i32>} : memref<1x8x256xf32, #tpu.memory_space<vmem>>, vector<1x8x256xf32>,
    return
  }
  func.func @transform_0(%arg0: i32, %arg1: i32) -> (i32, i32, i32) {
    %c0_i32 = arith.constant 0 : i32
    %c0_i32_0 = arith.constant 0 : i32
    return %arg0, %c0_i32, %arg1 : i32, i32, i32
  }
  func.func @transform_1(%arg0: i32, %arg1: i32) -> (i32, i32) {
    %c0_i32 = arith.constant 0 : i32
    %c0_i32_0 = arith.constant 0 : i32
    %c0_i32_1 = arith.constant 0 : i32
    return %c0_i32, %c0_i32_0 : i32, i32
  }
  func.func @transform_2(%arg0: i32, %arg1: i32) -> (i32, i32) {
    %c0_i32 = arith.constant 0 : i32
    %c0_i32_0 = arith.constant 0 : i32
    %c0_i32_1 = arith.constant 0 : i32
    return %c0_i32, %c0_i32_0 : i32, i32
  }
  func.func @transform_3(%arg0: i32, %arg1: i32) -> (i32, i32) {
    %c0_i32 = arith.constant 0 : i32
    %c0_i32_0 = arith.constant 0 : i32
    %c0_i32_1 = arith.constant 0 : i32
    return %c0_i32, %c0_i32_0 : i32, i32
  }
  func.func @transform_4(%arg0: i32, %arg1: i32) -> (i32, i32) {
    %c0_i32 = arith.constant 0 : i32
    %c0_i32_0 = arith.constant 0 : i32
    %c0_i32_1 = arith.constant 0 : i32
    return %c0_i32, %c0_i32_0 : i32, i32
  }
  func.func @transform_5(%arg0: i32, %arg1: i32) -> (i32, i32) {
    %c0_i32 = arith.constant 0 : i32
    %c0_i32_0 = arith.constant 0 : i32
    %c0_i32_1 = arith.constant 0 : i32
    return %c0_i32, %c0_i32_0 : i32, i32
  }
  func.func @transform_6(%arg0: i32, %arg1: i32) -> (i32, i32) {
    %c0_i32 = arith.constant 0 : i32
    %c0_i32_0 = arith.constant 0 : i32
    %c0_i32_1 = arith.constant 0 : i32
    return %c0_i32, %c0_i32_0 : i32, i32
  }
  func.func @transform_7(%arg0: i32, %arg1: i32) -> (i32, i32) {
    %c0_i32 = arith.constant 0 : i32
    %c0_i32_0 = arith.constant 0 : i32
    %c0_i32_1 = arith.constant 0 : i32
    return %c0_i32, %c0_i32_0 : i32, i32
  }
  func.func @transform_8(%arg0: i32, %arg1: i32) -> (i32, i32) {
    %c0_i32 = arith.constant 0 : i32
    %c0_i32_0 = arith.constant 0 : i32
    %c0_i32_1 = arith.constant 0 : i32
    return %c0_i32, %c0_i32_0 : i32, i32
  }
  func.func @transform_9(%arg0: i32, %arg1: i32) -> (i32, i32, i32) {
    %c0_i32 = arith.constant 0 : i32
    %c0_i32_0 = arith.constant 0 : i32
    return %arg0, %c0_i32, %arg1 : i32, i32, i32
  }
}

</mosaic_0001>

<bundles_post_ra>
// kernel: embedding_decoder_forward.1
= control target key start
LH: loop header
LB: loop body
LE: loop exit
PB: predicated region body
PF: predicated region fallthrough
CT: control target
= control target key end

     0   :  { %s856_s30 = smov 0   ;;  %s858_s10 = smov 0   ;;  %s932_s0 = inlined_call_operand.vmem [shape: f32[2,4,256], index: 0, kind: input, shape index: {}]   ;;  %s933_s1 = inlined_call_operand.vmem [shape: bf16[32,4], index: 1, kind: input, shape index: {}]   ;;  %s934_s2 = inlined_call_operand.vmem [shape: f32[32,1], index: 2, kind: input, shape index: {}]   ;;  %s935_s3 = inlined_call_operand.vmem [shape: bf16[16,32], index: 3, kind: input, shape index: {}]   ;;  %s936_s4 = inlined_call_operand.vmem [shape: f32[16,1], index: 4, kind: input, shape index: {}]   ;;  %s937_s5 = inlined_call_operand.vmem [shape: bf16[8,16], index: 5, kind: input, shape index: {}]   ;;  %s938_s6 = inlined_call_operand.vmem [shape: f32[8,1], index: 6, kind: input, shape index: {}]   ;;  %s939_s7 = inlined_call_operand.vmem [shape: bf16[8,8], index: 7, kind: input, shape index: {}]   ;;  %s940_s8 = inlined_call_operand.vmem [shape: f32[8,1], index: 8, kind: input, shape index: {}]   ;;  %s941_s9 = inlined_call_operand.vmem [shape: f32[2,8,256], index: 9, kind: output, shape index: {}]  }
   0x1   :  { %s860_s11 = smov 0  }
   0x2 LB: > { %s31_s12 = sadd.s32 1, %s799_s10  ;;  %p719_p0 = scmp.ge.s32.totalorder %s803_s11, 1  ;;  %s803_s11 = sphi %s860_s11, %s19_s11   ;;  %s799_s10 = sphi %s858_s10, %s943_s10   ;;  %s795_s30 = sphi %s856_s30, %s942_s30  }
   0x3   : > { %p33_p1 = scmp.ge.s32.totalorder %s31_s12, 2  ;;  %p308_p2 = scmp.lt.s32.totalorder %s803_s11, 3 }
   0x5   : > { %s945_s12 = smov (%p33_p1, %s31_s12), 0  ;;  %p309_p3 = pnand %p719_p0, %p308_p2 }
   0x6   : > { %p353_p4 = scmp.lt.s32.totalorder (!%p309_p3), %s795_s30, 1 }
   0x7   : > { %312 = sbr.rel (%p309_p3) target bundleno = 619 (0x26b), region = 56 }
   0xc   : > { %v383_v0 = vld [vmem:[%s934_s2 + $0x10] sm:$0xff]  ;;  %v805_v1 = vmov 0   ;;  %v381_v2 = vld [vmem:[%s934_s2] sm:$0xff]  ;;  %s947_s30 = smov (!%p353_p4, %s795_s30), 1  ;;  %v384_v4 = vld [vmem:[%s934_s2 + $0x18] sm:$0xff]  ;;  %vm435_vm0 = vcmask 1041408  }
   0xd   : > { %779 = vset.pattern.permute.xlu1 %v805_v1  ;;  %778 = vset.pattern.permute.xlu0 %v805_v1  ;;  %s748_s17 = sshll.u32 %s947_s30, 3  ;;  %v382_v5 = vld [vmem:[%s934_s2 + $0x8] sm:$0xff]  ;;  %v387_v10 = vld [vmem:[%s938_s6] sm:$0xff]  ;;  %vm428_vm1 = vcmask 31744   ;;  %vm507_vm2 = vcmask 261120   ;;  %vm550_vm3 = vcmask 130048  }
   0xe   : > { %410 = vperm.xlu0 %778, %v383_v0   ;;  %400 = vperm.xlu1 %779, %v381_v2   ;;  %s360_s20 = scalar_lea.vmem %s932_s0, %s748_s17  ;;  %v388_v11 = vld [vmem:[%s940_s8] sm:$0xff]  ;;  %v751_v15 = vld [vmem:[%s933_s1 + $0x8] sm:$0xff]  ;;  %vm593_vm4 = vcmask 1043456   ;;  %vm589_vm5 = vcmask 64512   ;;  %s749_s26 = sshll.u32 %s947_s30, 4 }
   0xf   : > { %780 = vset.pattern.permute.xlu2 %v805_v1  ;;  %v389_v3 = vld [vmem:[%s360_s20] sm:$0xff]  ;;  %v386_v22 = vld [vmem:[%s936_s4 + $0x8] sm:$0xff]  ;;  %s370_s29 = scalar_lea.vmem %s941_s9, %s749_s26 }
  0x10   : > { %391 = vst [vmem:[#allocation1] ss:$2 sm:$0xff] %v389_v3  ;;  %v750_v14 = vld [vmem:[%s933_s1] sm:$0xff] }
  0x11   : > { %v385_v18 = vld [vmem:[%s936_s4] sm:$0xff] }
  0x12   : > { %494 = vperm.xlu2 %780, %v385_v18   ;;  %v752_v50 = vld [vmem:[%s935_s3] sm:$0xff] }
  0x13   : > { %v379_v3 = vld [vmem:[%s937_s5] sm:$0xf] }
  0x16   : > { %415 = vperm.xlu0 %778, %v384_v4   ;;  %405 = vperm.xlu1 %779, %v382_v5  }
  0x17   : > { %v392_v6 = vld.sshfl [vmem:[#allocation1] sm:$0xff pattern:$0x75316420]  ;;  %v393_v7 = vld.sshfl [vmem:[#allocation1 + $0x8] sm:$0xff pattern:$0x75316420] }
  0x18   : > { %v396_v8 = vpack.c.bf16 %v392_v6, %v392_v6  ;;  %v397_v9 = vpack.c.bf16 %v393_v7, %v393_v7 }
  0x1a   : > { %v437_v12 = vsel %vm435_vm0, %v396_v8, 0  ;;  %v440_v13 = vsel %vm435_vm0, %v397_v9, 0  ;;  %499 = vperm.xlu2 %780, %v386_v22  }
  0x1b   : > { %449 = vmatpush.bf16.msra.mxu0 %v437_v12  ;;  %468 = vmatpush.bf16.msra.mxu1 %v440_v13 }
  0x1e   : > { %547 = vperm.xlu0 %778, %v387_v10   ;;  %586 = vperm.xlu1 %779, %v388_v11  }
  0x1f   : > { %732 = vmatmul.msk.bf16.vlgmr.msra.gmra.mxu0 %vm428_vm1, %v750_v14  ;;  %734 = vmatmul.msk.bf16.vlgmr.msra.gmra.mxu1 %vm428_vm1, %v750_v14 }
  0x2f   : > { %733 = vmatmul.msk.bf16.gmra.mxu0 %vm428_vm1, %v751_v15  ;;  %735 = vmatmul.msk.bf16.gmra.mxu1 %vm428_vm1, %v751_v15 }
  0x6c   : > { %v495_v51 = vpop.permute.xlu2 %494 }
  0x74   : > { %v500_v54 = vpop.permute.xlu2 %499 }
  0x80   : > { %v401_v21 = vpop.permute.xlu1 %400  ;;  %v411_v23 = vpop.permute.xlu0 %410 }
  0x88   : > { %v406_v26 = vpop.permute.xlu1 %405  ;;  %v416_v27 = vpop.permute.xlu0 %415 }
  0x90   : > { %v548_v4 = vpop.permute.xlu0 %547  ;;  %v587_v18 = vpop.permute.xlu1 %586 }
  0x9c   : > { %v451_v16 = vpop.f32.mrf.mxu0  ;;  %v470_v17 = vpop.f32.mrf.mxu1 }
  0x9d   : > { %v452_v36 = vadd.f32 %v451_v16, %v401_v21  ;;  %v471_v37 = vadd.f32 %v470_v17, %v401_v21  ;;  %v380_v17 = vld [vmem:[%s939_s7] sm:$0xf] }
  0x9f   : > { %v480_v46 = vmax.f32 %v452_v36, 0.0  ;;  %v481_v47 = vmax.f32 %v471_v37, 0.0 }
  0xa4   : > { %v453_v19 = vpop.f32.mrf.mxu0  ;;  %v472_v20 = vpop.f32.mrf.mxu1 }
  0xa5   : > { %v454_v32 = vadd.f32 %v453_v19, %v406_v26  ;;  %v473_v33 = vadd.f32 %v472_v20, %v406_v26 }
  0xa7   : > { %v482_v42 = vmax.f32 %v454_v32, 0.0  ;;  %v483_v43 = vmax.f32 %v473_v33, 0.0 }
  0xa9   : > { %v488_v48 = vpack.c.bf16 %v482_v42, %v480_v46  ;;  %v489_v49 = vpack.c.bf16 %v483_v43, %v481_v47 }
  0xac   : > { %v456_v24 = vpop.f32.mrf.mxu0  ;;  %v475_v25 = vpop.f32.mrf.mxu1 }
  0xad   : > { %v457_v28 = vadd.f32 %v456_v24, %v411_v23  ;;  %v476_v29 = vadd.f32 %v475_v25, %v411_v23 }
  0xaf   : > { %v484_v38 = vmax.f32 %v457_v28, 0.0  ;;  %v485_v39 = vmax.f32 %v476_v29, 0.0 }
  0xb4   : > { %v458_v30 = vpop.f32.mrf.mxu0  ;;  %v477_v31 = vpop.f32.mrf.mxu1 }
  0xb5   : > { %v459_v34 = vadd.f32 %v458_v30, %v416_v27  ;;  %v478_v35 = vadd.f32 %v477_v31, %v416_v27 }
  0xb7   : > { %v486_v40 = vmax.f32 %v459_v34, 0.0  ;;  %v487_v41 = vmax.f32 %v478_v35, 0.0 }
  0xb9   : > { %v490_v44 = vpack.c.bf16 %v486_v40, %v484_v38  ;;  %v491_v45 = vpack.c.bf16 %v487_v41, %v485_v39 }
  0xbb   : > { %517 = vmatpush.bf16.msra.mxu2 %v490_v44  ;;  %531 = vmatpush.bf16.msra.mxu3 %v491_v45 }
  0xbf   : > { %518 = vmatpush.bf16.msra.mxu2 %v488_v48  ;;  %532 = vmatpush.bf16.msra.mxu3 %v489_v49 }
  0xc2   : > { %740 = vmatmul.msk.bf16.vlgmr.msra.gmra.mxu2 %vm507_vm2, %v752_v50  ;;  %741 = vmatmul.msk.bf16.vlgmr.msra.gmra.mxu3 %vm507_vm2, %v752_v50 }
 0x145   : > { %v520_v52 = vpop.f32.mrf.mxu2  ;;  %v534_v53 = vpop.f32.mrf.mxu3 }
 0x146   : > { %v521_v55 = vadd.f32 %v520_v52, %v495_v51  ;;  %v535_v56 = vadd.f32 %v534_v53, %v495_v51 }
 0x148   : > { %v539_v61 = vmax.f32 %v521_v55, 0.0  ;;  %v540_v62 = vmax.f32 %v535_v56, 0.0 }
 0x14d   : > { %v522_v57 = vpop.f32.mrf.mxu2  ;;  %v536_v58 = vpop.f32.mrf.mxu3 }
 0x14e   : > { %v523_v59 = vadd.f32 %v522_v57, %v500_v54  ;;  %v537_v60 = vadd.f32 %v536_v58, %v500_v54 }
 0x150   : > { %v541_v63 = vmax.f32 %v523_v59, 0.0  ;;  %v542_v0 = vmax.f32 %v537_v60, 0.0 }
 0x152   : > { %v543_v1 = vpack.c.bf16 %v541_v63, %v539_v61  ;;  %v544_v2 = vpack.c.bf16 %v542_v0, %v540_v62 }
 0x154   : > { %561 = vmatpush.bf16.msrb.mxu2 %v543_v1  ;;  %574 = vmatpush.bf16.msrb.mxu3 %v544_v2 }
 0x157   : > { %742 = vmatmul.msk.bf16.vlgmr.msrb.gmra.mxu2 %vm550_vm3, %v379_v3  ;;  %743 = vmatmul.msk.bf16.vlgmr.msrb.gmra.mxu3 %vm550_vm3, %v379_v3 }
 0x1da   : > { %v563_v5 = vpop.f32.mrf.mxu2  ;;  %v576_v6 = vpop.f32.mrf.mxu3 }
 0x1db   : > { %v564_v7 = vadd.f32 %v563_v5, %v548_v4  ;;  %v577_v8 = vadd.f32 %v576_v6, %v548_v4 }
 0x1dd   : > { %v580_v9 = vmax.f32 %v564_v7, 0.0  ;;  %v581_v10 = vmax.f32 %v577_v8, 0.0 }
 0x1df   : > { %v582_v11 = vpack.c.bf16 %v580_v9, %v580_v9  ;;  %v583_v12 = vpack.c.bf16 %v581_v10, %v581_v10 }
 0x1e1   : > { %v595_v13 = vsel %vm593_vm4, %v582_v11, 0  ;;  %v598_v14 = vsel %vm593_vm4, %v583_v12, 0 }
 0x1e2   : > { %v565_v15 = vpop.f32.mrf.mxu2  ;;  %v578_v16 = vpop.f32.mrf.mxu3  ;;  %607 = vmatpush.bf16.msrb.mxu0 %v595_v13  ;;  %620 = vmatpush.bf16.msrb.mxu1 %v598_v14 }
 0x1e5   : > { %744 = vmatmul.msk.bf16.vlgmr.msrb.gmra.mxu0 %vm589_vm5, %v380_v17  ;;  %745 = vmatmul.msk.bf16.vlgmr.msrb.gmra.mxu1 %vm589_vm5, %v380_v17 }
 0x262   : > { %v609_v19 = vpop.f32.mrf.mxu0  ;;  %v622_v20 = vpop.f32.mrf.mxu1 }
 0x263   : > { %v610_v21 = vadd.f32 %v609_v19, %v587_v18  ;;  %v623_v22 = vadd.f32 %v622_v20, %v587_v18 }
 0x265   : > { %626 = vst [vmem:[%s370_s29] sm:$0xff] %v610_v21 }
 0x266   : > { %627 = vst [vmem:[%s370_s29 + $0x8] sm:$0xff] %v623_v22 }
 0x26a   : > { %v611_v23 = vpop.f32.mrf.mxu0  ;;  %v624_v24 = vpop.f32.mrf.mxu1 }
 0x26b PF: > { %s19_s11 = sadd.s32 1, %s803_s11   ;;  %s942_s30 = smov %s799_s10 }
 0x26c   : > { %p16_p5 = scmp.ge.s32.totalorder %s19_s11, 4   ;;  %s943_s10 = smov %s945_s12 }
 0x26e   :  { %18 = sbr.rel (!%p16_p5) target bundleno = 2 (0x2), region = 86 }

</bundles_post_ra>
